<compile_context>
chip_gen: v6e
topology: v6e:2x2x1
jax: 0.10.0
libtpu: 0.0.40
codegen_flags: <defaults>
</compile_context>

<pallas_src>
import functools

import numpy as np

import jax
import jax.numpy as jnp
from jax import lax
from jax.experimental import pallas as pl
from jax.experimental.pallas import tpu as pltpu


def _hetero_loss_kernel(f1_ref, f2_ref, out_ref, *, margin, dist_type, group_size):
    i = pl.program_id(0)

    inv_g = jnp.float32(1.0 / group_size)
    c1 = jnp.sum(f1_ref[...].astype(jnp.float32), axis=0, keepdims=True) * inv_g  # (1, D)
    c2 = jnp.sum(f2_ref[...].astype(jnp.float32), axis=0, keepdims=True) * inv_g  # (1, D)

    if dist_type == "cos":
        # One fused lane reduction for [dot, ||c1||^2, ||c2||^2].
        stacked = jnp.concatenate([c1 * c2, c1 * c1, c2 * c2], axis=0)        # (3, D)
        sums = jnp.sum(stacked, axis=-1, keepdims=True)                        # (3, 1)
        dot = sums[0:1, :]
        n1_sq = sums[1:2, :]
        n2_sq = sums[2:3, :]
        eps_sq = jnp.float32(1e-16)  # (torch eps = 1e-8)^2: clamp squared norms
        cos = (dot
               * lax.rsqrt(jnp.maximum(n1_sq, eps_sq))
               * lax.rsqrt(jnp.maximum(n2_sq, eps_sq)))                        # (1, 1)
        term = jnp.maximum(jnp.float32(0.0),
                           jnp.float32(1.0) - cos - jnp.float32(margin))
    elif dist_type == "l2":
        diff = c1 - c2
        mse = jnp.sum(diff * diff, keepdims=True)                              # (1, 1)
        term = jnp.maximum(jnp.float32(0.0), mse - jnp.float32(margin))
    else:  # 'l1'
        mae = jnp.mean(jnp.abs(c1 - c2), keepdims=True)                        # (1, 1)
        term = jnp.maximum(jnp.float32(0.0), mae - jnp.float32(margin))

    @pl.when(i == 0)
    def _():
        out_ref[...] = term

    @pl.when(i != 0)
    def _():
        out_ref[...] = out_ref[...] + term


def hetero_loss(feat1, feat2, label, *, margin=0.0001, dist_type="l2"):
    """Pallas implementation of hetero_loss.forward."""
    assert dist_type in ("l2", "cos", "l1")
    # torch uses only the count of unique labels (groups are sequential chunks).
    label_num = int(np.unique(np.asarray(label)).size)
    feat_num, feat_size = feat1.shape
    # TODO(synk): torch.chunk with feat_num % label_num != 0 yields an unequal
    # trailing chunk; only the equal-chunk case (same #samples per identity) is
    # implemented here.
    assert feat_num % label_num == 0, "unequal chunks not supported"
    group_size = feat_num // label_num

    kernel = functools.partial(
        _hetero_loss_kernel,
        margin=float(margin),
        dist_type=dist_type,
        group_size=group_size,
    )

    out = pl.pallas_call(
        kernel,
        out_shape=jax.ShapeDtypeStruct((1, 1), jnp.float32),
        grid=(label_num,),
        in_specs=[
            pl.BlockSpec((group_size, feat_size), lambda i: (i, 0)),
            pl.BlockSpec((group_size, feat_size), lambda i: (i, 0)),
        ],
        # Constant block index -> resident accumulator across the grid.
        out_specs=pl.BlockSpec((1, 1), lambda i: (0, 0)),
        compiler_params=pltpu.CompilerParams(
            dimension_semantics=("arbitrary",)),  # sequential: output accumulates
    )(feat1, feat2)
    # torch.tensor(dist) -> 0-d float32 tensor; return a 0-d array here.
    return out[0, 0]


def _reference(feat1, feat2, label, margin=0.0001, dist_type="l2"):
    label_num = int(np.unique(np.asarray(label)).size)
    n, _ = feat1.shape
    g = n // label_num
    total = jnp.float32(0.0)
    for i in range(label_num):
        c1 = jnp.mean(feat1[i * g:(i + 1) * g].astype(jnp.float32), axis=0)
        c2 = jnp.mean(feat2[i * g:(i + 1) * g].astype(jnp.float32), axis=0)
        if dist_type == "l2":
            d = jnp.sum((c1 - c2) ** 2)
            term = jnp.maximum(0.0, d - margin)
        elif dist_type == "cos":
            eps = 1e-8
            cos = jnp.dot(c1, c2) / (
                jnp.maximum(jnp.linalg.norm(c1), eps)
                * jnp.maximum(jnp.linalg.norm(c2), eps))
            term = jnp.maximum(0.0, 1.0 - cos - margin)
        else:
            term = jnp.maximum(0.0, jnp.mean(jnp.abs(c1 - c2)) - margin)
        total = total + term
    return total


if __name__ == "__main__":
    key = jax.random.PRNGKey(0)
    k1, k2 = jax.random.split(key)
    N, D, label_num = 32, 128, 4  # 4 identities, 8 samples each, hidden=128
    feat1 = jax.random.normal(k1, (N, D), dtype=jnp.float32)
    feat2 = jax.random.normal(k2, (N, D), dtype=jnp.float32)
    label = jnp.repeat(jnp.arange(label_num, dtype=jnp.int32), N // label_num)

    ok = True
    for dist_type in ("l2", "cos", "l1"):
        out = hetero_loss(feat1, feat2, label, dist_type=dist_type)
        out = jax.block_until_ready(out)
        ref = _reference(feat1, feat2, label, dist_type=dist_type)
        ok = ok and bool(jnp.allclose(out, ref, atol=1e-5, rtol=1e-5))
    assert ok
    print("KERNEL_OK")
</pallas_src>

<mosaic_0001>
module attributes {stable_mosaic.version = 11 : i64} {
  func.func @_hetero_loss_kernel(%arg0: i32, %arg1: memref<8x128xf32, #tpu.memory_space<vmem>>, %arg2: memref<8x128xf32, #tpu.memory_space<vmem>>, %arg3: memref<1x1xf32, #tpu.memory_space<vmem>>) attributes {dimension_semantics = [#tpu.dimension_semantics<arbitrary>], iteration_bounds = array<i64: 4>, scalar_prefetch = 0 : i64, scratch_operands = 0 : i64, tpu.core_type = #tpu.core_type<tc>, window_params = [{transform_indices = @transform_0, window_bounds = array<i64: 8, 128>}, {transform_indices = @transform_1, window_bounds = array<i64: 8, 128>}, {pipeline_mode = #tpu.pipeline_mode<synchronous>, transform_indices = @transform_2, window_bounds = array<i64: 1, 1>}]} {
    %c0 = arith.constant 0 : index
    %c0_0 = arith.constant 0 : index
    %0 = vector.load %arg1[%c0, %c0_0] : memref<8x128xf32, #tpu.memory_space<vmem>>, vector<8x128xf32>
    %cst = arith.constant dense<0.000000e+00> : vector<128xf32>
    %1 = vector.multi_reduction <add>, %0, %cst [0] : vector<8x128xf32> to vector<128xf32>
    %2 = vector.shape_cast %1 : vector<128xf32> to vector<1x128xf32>
    %cst_1 = arith.constant 1.250000e-01 : f32
    %3 = vector.broadcast %cst_1 : f32 to vector<1x128xf32>
    %4 = arith.mulf %2, %3 : vector<1x128xf32>
    %c0_2 = arith.constant 0 : index
    %c0_3 = arith.constant 0 : index
    %5 = vector.load %arg2[%c0_2, %c0_3] : memref<8x128xf32, #tpu.memory_space<vmem>>, vector<8x128xf32>
    %cst_4 = arith.constant dense<0.000000e+00> : vector<128xf32>
    %6 = vector.multi_reduction <add>, %5, %cst_4 [0] : vector<8x128xf32> to vector<128xf32>
    %7 = vector.shape_cast %6 : vector<128xf32> to vector<1x128xf32>
    %cst_5 = arith.constant 1.250000e-01 : f32
    %8 = vector.broadcast %cst_5 : f32 to vector<1x128xf32>
    %9 = arith.mulf %7, %8 : vector<1x128xf32>
    %10 = arith.subf %4, %9 : vector<1x128xf32>
    %11 = arith.mulf %10, %10 : vector<1x128xf32>
    %12 = vector.shape_cast %11 : vector<1x128xf32> to vector<1x1x128xf32>
    %cst_6 = arith.constant dense<0.000000e+00> : vector<1xf32>
    %13 = vector.multi_reduction <add>, %12, %cst_6 [1, 2] : vector<1x1x128xf32> to vector<1xf32>
    %14 = vector.shape_cast %13 : vector<1xf32> to vector<1x1x1xf32>
    %15 = vector.extract %14[0, 0, 0] : f32 from vector<1x1x1xf32>
    %16 = vector.broadcast %15 : f32 to vector<1x1xf32>
    %cst_7 = arith.constant 9.99999974E-5 : f32
    %17 = vector.broadcast %cst_7 : f32 to vector<1x1xf32>
    %18 = arith.subf %16, %17 : vector<1x1xf32>
    %cst_8 = arith.constant 0.000000e+00 : f32
    %19 = vector.broadcast %cst_8 : f32 to vector<1x1xf32>
    %20 = arith.maximumf %19, %18 : vector<1x1xf32>
    %c0_i32 = arith.constant 0 : i32
    %21 = arith.cmpi eq, %arg0, %c0_i32 : i32
    %22 = arith.extui %21 : i1 to i32
    %c0_i32_9 = arith.constant 0 : i32
    %23 = arith.cmpi ne, %22, %c0_i32_9 : i32
    scf.if %23 {
      %c0_12 = arith.constant 0 : index
      %c0_13 = arith.constant 0 : index
      %27 = vector.load %arg3[%c0_12, %c0_13] : memref<1x1xf32, #tpu.memory_space<vmem>>, vector<1x1xf32>
      tpu.vector_store %arg3[%c0_12, %c0_13], %20 {strides = array<i32>} : memref<1x1xf32, #tpu.memory_space<vmem>>, vector<1x1xf32>,
    } else {
    }
    %c0_i32_10 = arith.constant 0 : i32
    %24 = arith.cmpi ne, %arg0, %c0_i32_10 : i32
    %25 = arith.extui %24 : i1 to i32
    %c0_i32_11 = arith.constant 0 : i32
    %26 = arith.cmpi ne, %25, %c0_i32_11 : i32
    scf.if %26 {
      %c0_12 = arith.constant 0 : index
      %c0_13 = arith.constant 0 : index
      %27 = vector.load %arg3[%c0_12, %c0_13] : memref<1x1xf32, #tpu.memory_space<vmem>>, vector<1x1xf32>
      %28 = arith.addf %27, %20 : vector<1x1xf32>
      %c0_14 = arith.constant 0 : index
      %c0_15 = arith.constant 0 : index
      %29 = vector.load %arg3[%c0_14, %c0_15] : memref<1x1xf32, #tpu.memory_space<vmem>>, vector<1x1xf32>
      tpu.vector_store %arg3[%c0_14, %c0_15], %28 {strides = array<i32>} : memref<1x1xf32, #tpu.memory_space<vmem>>, vector<1x1xf32>,
    } else {
    }
    return
  }
  func.func @transform_0(%arg0: i32) -> (i32, i32) {
    %c0_i32 = arith.constant 0 : i32
    %c0_i32_0 = arith.constant 0 : i32
    return %arg0, %c0_i32 : i32, i32
  }
  func.func @transform_1(%arg0: i32) -> (i32, i32) {
    %c0_i32 = arith.constant 0 : i32
    %c0_i32_0 = arith.constant 0 : i32
    return %arg0, %c0_i32 : i32, i32
  }
  func.func @transform_2(%arg0: i32) -> (i32, i32) {
    %c0_i32 = arith.constant 0 : i32
    %c0_i32_0 = arith.constant 0 : i32
    %c0_i32_1 = arith.constant 0 : i32
    return %c0_i32, %c0_i32_0 : i32, i32
  }
}

</mosaic_0001>

<bundles_post_ra>
// kernel: tpu_custom_call.1
= control target key start
LH: loop header
LB: loop body
LE: loop exit
PB: predicated region body
PF: predicated region fallthrough
CT: control target
= control target key end

     0   :  { %7 = vsyncpa [#allocation3], 0  ;;  %s686_s0 = inlined_call_operand.hbm [shape: f32[32,128], index: 0, kind: input, shape index: {}]   ;;  %s687_s1 = inlined_call_operand.hbm [shape: f32[32,128], index: 1, kind: input, shape index: {}]   ;;  %s688_s2 = inlined_call_operand.hbm [shape: f32[1,1], index: 2, kind: output, shape index: {}]  }
   0x1   :  { %9 = vsyncpa [#allocation3 + $0x1], 0 }
   0x2   :  { %10 = vsyncpa [#allocation6], 0 }
   0x3   :  { %12 = vsyncpa [#allocation6 + $0x1], 0 }
   0x4   :  { %13 = vsyncpa [#allocation4], 0  ;;  %s522_s9 = smov 0   ;;  %s524_s10 = smov 0  }
   0x5   :  { %s526_s11 = smov 0   ;;  %s528_s12 = smov 0  }
   0x6 LB: > { %s541_s13 = sadd.s32 4294967295, %s502_s12   ;;  %s544_s14 = sadd.s32 1, %s502_s12   ;;  %s502_s12 = sphi %s528_s12, %s702_s12   ;;  %s498_s11 = sphi %s526_s11, %s701_s11   ;;  %s494_s10 = sphi %s524_s10, %s700_s10   ;;  %s490_s9 = sphi %s522_s9, %s699_s9  }
   0x7   : > { %s23_s15 = ssub.s32 %s502_s12, %s544_s14  ;;  %s26_s16 = sadd.s32 1, %s498_s11 }
   0x8   : > { %p24_p0 = scmp.eq.s32.totalorder %s23_s15, 0  ;;  %p33_p1 = scmp.ne.s32.totalorder %s498_s11, %s494_s10 }
   0x9   : > { %p34_p2 = scmp.eq.s32.totalorder %s502_s12, 0  ;;  %p39_p3 = scmp.ne.s32.totalorder %s494_s10, %s490_s9 }
   0xa   : > { %s554_s17 = scalar_select %p24_p0, %s498_s11, %s26_s16  }
   0xb   : > { %p35_p4 = por %p34_p2, %p33_p1  ;;  %p689_p5 = scmp.eq.s32.totalorder %s541_s13, 0 }
   0xc   : > { %p344_p6 = scmp.lt.s32.totalorder %s502_s12, 4  ;;  %s565_s19 = sand.u32 1, %s498_s11  }
   0xd   : > { %p560_p7 = por %p689_p5, %p39_p3  ;;  %s313_s20 = sshll.u32 %s565_s19, 3 }
   0xe   : > { %s314_s21 = sshll.u32 %s502_s12, 7  ;;  %s114_s25 = scalar_lea.vmem [#allocation2], %s313_s20 }
   0xf   : > { %s691_s18 = scalar_select %p560_p7, 1, 0 }
  0x10   : > { %s574_s24 = scalar_lea.hbm %s686_s0, %s314_s21  ;;  %s121_s26 = sshll.u32 %s114_s25, 4  ;;  %s578_s26 = int_to_ptr.vmem [resolvable:$true] %s121_s26 }
  0x11   : > { %p580_p8 = pnand %p344_p6, %p35_p4  ;;  %s111_s28 = scalar_lea.sflag [#allocation3], %s565_s19 }
  0x12   : > { %s380_s29 = scalar_lea.hbm %s574_s24, 128  ;;  %s385_s4 = scalar_lea.hbm %s686_s0, 512 }
  0x13   : > { %p381_p11 = scmp.ne.s32.totalorder %s574_s24, %s380_s29  ;;  %p382_p12 = pneg %p580_p8 }
  0x14   : > { %p386_p1 = scmp.lt.s32.totalorder %s574_s24, %s686_s0  ;;  %p387_p2 = scmp.lt.s32.totalorder %s385_s4, %s380_s29 }
  0x15   : > { %p383_p13 = pnand %p382_p12, %p381_p11 }
  0x16   : > { %p388_p3 = por %p387_p2, %p386_p1 }
  0x17   : > { %p384_p0 = pneg %p383_p13 }
  0x19   : > { %p389_p4 = pnand %p388_p3, %p384_p0 }
  0x1b   : > { %392 = shalt.err (!%p389_p4)
}
  0x1c   : > { %s393_s7 = scalar_lea.vmem %s578_s26, 128  ;;  %s504_s8 = smov [#allocation2]  }
  0x1d   : > { %p394_p6 = scmp.ne.s32.totalorder %s578_s26, %s393_s7  ;;  %s398_s9 = sshll.u32 %s504_s8, 4  ;;  %s399_s9 = int_to_ptr.vmem [resolvable:$false] %s398_s9 }
  0x1e   : > { %s400_s15 = scalar_lea.vmem %s399_s9, 256  ;;  %p401_p5 = scmp.lt.s32.totalorder %s578_s26, %s399_s9 }
  0x1f   : > { %p396_p11 = pnand %p394_p6, %p382_p12  ;;  %p402_p9 = scmp.lt.s32.totalorder %s400_s15, %s393_s7 }
  0x21   : > { %p397_p13 = pneg %p396_p11  ;;  %p403_p10 = por %p402_p9, %p401_p5 }
  0x23   : > { %p404_p1 = pnand %p403_p10, %p397_p13 }
  0x25   : > { %407 = shalt.err (!%p404_p1)
}
  0x26   : > { %340 = dma.hbm_to_vmem [thread:$0]  (!%p580_p8), %s574_s24, 128, %s578_s26, %s111_s28  }
  0x27   : > { %p693_p0 = scmp.lt.s32.totalorder %s502_s12, 5  ;;  %p694_p2 = scmp.ge.s32.totalorder %s502_s12, 1 }
  0x28   : > { %s624_s25 = scalar_lea.hbm %s687_s1, %s314_s21  ;;  %s132_s29 = scalar_lea.vmem [#allocation5], %s313_s20 }
  0x29   : > { %p615_p3 = pnand %p694_p2, %p693_p0  ;;  %s139_s30 = sshll.u32 %s132_s29, 4  ;;  %s140_s30 = int_to_ptr.vmem [resolvable:$true] %s139_s30 }
  0x2a   : > { %s129_s24 = scalar_lea.sflag [#allocation6], %s565_s19  ;;  %s408_s26 = scalar_lea.hbm %s624_s25, 128 }
  0x2b   : > { %s695_s16 = scalar_select %p615_p3, 1, 0 }
  0x2c   : > { %p409_p5 = scmp.ne.s32.totalorder %s624_s25, %s408_s26  ;;  %s413_s3 = scalar_lea.hbm %s687_s1, 512 }
  0x2d   : > { %p414_p4 = scmp.lt.s32.totalorder %s624_s25, %s687_s1  ;;  %p415_p6 = scmp.lt.s32.totalorder %s413_s3, %s408_s26 }
  0x2e   : > { %p411_p9 = pnand %p409_p5, %p382_p12 }
  0x2f   : > { %p416_p11 = por %p415_p6, %p414_p4 }
  0x30   : > { %p412_p10 = pneg %p411_p9 }
  0x32   : > { %p417_p13 = pnand %p416_p11, %p412_p10 }
  0x34   : > { %420 = shalt.err (!%p417_p13)
}
  0x35   : > { %s421_s20 = scalar_lea.vmem %s140_s30, 128  ;;  %s505_s19 = smov [#allocation5]  }
  0x36   : > { %p422_p1 = scmp.ne.s32.totalorder %s140_s30, %s421_s20  ;;  %s426_s5 = sshll.u32 %s505_s19, 4  ;;  %s427_s5 = int_to_ptr.vmem [resolvable:$false] %s426_s5 }
  0x37   : > { %s428_s6 = scalar_lea.vmem %s427_s5, 256  ;;  %p429_p5 = scmp.lt.s32.totalorder %s140_s30, %s427_s5 }
  0x38   : > { %p424_p0 = pnand %p422_p1, %p382_p12  ;;  %p430_p9 = scmp.lt.s32.totalorder %s428_s6, %s421_s20 }
  0x3a   : > { %p425_p2 = pneg %p424_p0  ;;  %p431_p7 = por %p430_p9, %p429_p5 }
  0x3c   : > { %p432_p3 = pnand %p431_p7, %p425_p2 }
  0x3e   : > { %435 = shalt.err (!%p432_p3)
}
  0x3f   : > { %343 = dma.hbm_to_vmem [thread:$0]  (!%p580_p8), %s624_s25, 128, %s140_s30, %s129_s24  }
  0x40   : > { %p696_p10 = scmp.ne.s32.totalorder %s695_s16, 0 }
  0x41   : > { %s150_s7 = sand.u32 (!%p696_p10), 1, %s494_s10   ;;  %p697_p12 = scmp.ne.s32.totalorder (!%p696_p10), %s691_s18, 0 }
  0x42   : > { %148 = sbr.rel (%p696_p10) target bundleno = 326 (0x146), region = 28  ;;  %s318_s8 = sshll.u32 (!%p696_p10), %s150_s7, 3 }
  0x43   : > { %s151_s9 = scalar_lea.sflag (!%p696_p10), [#allocation3], %s150_s7  ;;  %s154_s15 = scalar_lea.vmem (!%p696_p10), [#allocation2], %s318_s8 }
  0x47   : > { %477 = dma.done.wait (%p697_p12), %s151_s9, 128  }
  0x48   : > { %479 = vsyncadd (%p697_p12), %s151_s9, 4294967168  ;;  %s160_s22 = scalar_lea.sflag [#allocation6], %s150_s7  ;;  %s163_s23 = scalar_lea.vmem [#allocation5], %s318_s8 }
  0x49   : > { %481 = dma.done.wait (%p697_p12), %s160_s22, 128  }
  0x4a   : > { %483 = vsyncadd (%p697_p12), %s160_s22, 4294967168  ;;  %v184_v0 = vld [vmem:[%s154_s15] sm:$0xff]  ;;  %v192_v1 = vld [vmem:[%s163_s23] sm:$0xff]  ;;  %vm202_vm0 = vcmask 1040384   ;;  %p321_p7 = scmp.ne.s32.totalorder %s541_s13, 0 }
  0x4b   : > { %v185_v2 = vrot.slane %v184_v0, 4  ;;  %v193_v3 = vrot.slane %v192_v1, 4 }
  0x4d   : > { %v186_v4 = vadd.f32 %v185_v2, %v184_v0  ;;  %v194_v5 = vadd.f32 %v193_v3, %v192_v1 }
  0x4f   : > { %v187_v6 = vrot.slane %v186_v4, 2  ;;  %v195_v7 = vrot.slane %v194_v5, 2 }
  0x51   : > { %v188_v8 = vadd.f32 %v187_v6, %v186_v4  ;;  %v196_v9 = vadd.f32 %v195_v7, %v194_v5 }
  0x53   : > { %v189_v10 = vrot.slane %v188_v8, 1  ;;  %v197_v11 = vrot.slane %v196_v9, 1 }
  0x55   : > { %v190_v12 = vadd.f32 %v189_v10, %v188_v8  ;;  %v198_v13 = vadd.f32 %v197_v11, %v196_v9 }
  0x57   : > { %v191_v14 = vmul.f32 0.125, %v190_v12  ;;  %v199_v15 = vmul.f32 0.125, %v198_v13 }
  0x59   : > { %v200_v16 = vsub.f32 %v191_v14, %v199_v15 }
  0x5b   : > { %v201_v17 = vmul.f32 %v200_v16, %v200_v16 }
  0x5d   : > { %v203_v18 = vsel %vm202_vm0, %v201_v17, 0.0 }
  0x5e   : > { %204 = vadd.xlane.f32.xlu0 %v203_v18 }
  0xe7   : > { %v205_v19 = vpop.xlane.xlu0 %204 }
  0xe8   : > { %v206_v20 = vrot.slane %v205_v19, 4 }
  0xea   : > { %v207_v21 = vadd.f32 %v206_v20, %v205_v19 }
  0xec   : > { %v208_v22 = vrot.slane %v207_v21, 2 }
  0xee   : > { %v209_v23 = vadd.f32 %v208_v22, %v207_v21 }
  0xf0   : > { %v210_v24 = vrot.slane %v209_v23, 1 }
  0xf2   : > { %v211_v25 = vadd.f32 %v210_v24, %v209_v23 }
  0xf4   : > { %327 = vpush %v211_v25 }
 0x125   : > { %s328_s18 = spop %327  ;;  %219 = sbr.rel (%p321_p7) target bundleno = 300 (0x12c), region = 40 }
 0x126   : > { %v213_v26 = vstv %s328_s18 }
 0x127   : > { %v320_v27 = vadd.f32 -0.0001, %v213_v26 }
 0x129   : > { %v215_v28 = vmax.f32 %v320_v27, 0.0 }
 0x12a   : > { %vm220_vm1 = vcmask 0  }
 0x12b   : > { %221 = vst.msk [vmem:[#allocation7] sm:$0x1] %vm220_vm1, %v215_v28 }
 0x12c PF: > { %p698_p8 = scmp.eq.s32.totalorder %s541_s13, 0 }
 0x12e   : > { %225 = sbr.rel (%p698_p8) target bundleno = 311 (0x137), region = 44 }
 0x133   : > { %v226_v29 = vld [vmem:[#allocation7] sm:$0x1]  ;;  %vm228_vm2 = vcmask 0  }
 0x134   : > { %v227_v30 = vadd.f32 %v226_v29, %v215_v28 }
 0x136   : > { %229 = vst.msk [vmem:[#allocation7] sm:$0x1] %vm228_vm2, %v227_v30 }
 0x137 PF: > { %p345_p3 = scmp.eq.s32.totalorder %s541_s13, 3  ;;  %s506_s27 = smov [#allocation7]  }
 0x138   : > { %s237_s16 = sshll.u32 %s506_s27, 4  ;;  %s238_s16 = int_to_ptr.vmem [resolvable:$true] %s237_s16 }
 0x139   : > { %s436_s25 = scalar_lea.vmem %s238_s16, 16  ;;  %s442_s29 = scalar_lea.vmem %s238_s16, 32 }
 0x13a   : > { %p437_p4 = scmp.ne.s32.totalorder %s238_s16, %s436_s25  ;;  %p443_p13 = scmp.lt.s32.totalorder %s238_s16, %s238_s16 }
 0x13b   : > { %p444_p1 = scmp.lt.s32.totalorder %s442_s29, %s436_s25 }
 0x13c   : > { %p438_p6 = pnand %p437_p4, %p345_p3 }
 0x13d   : > { %p445_p0 = por %p444_p1, %p443_p13 }
 0x13e   : > { %p439_p11 = pneg %p438_p6 }
 0x140   : > { %p446_p2 = pnand %p445_p0, %p439_p11 }
 0x142   : > { %449 = shalt.err (!%p446_p2)
}
 0x143   : > { %334 = dma.vmem_to_hbm [thread:$0]  (%p345_p3), %s238_s16, 16, %s688_s2, [#allocation4]  }
 0x144   : > { %485 = dma.done.wait (%p345_p3), [#allocation4], 16  }
 0x145   : > { %487 = vsyncadd (%p345_p3), [#allocation4], 4294967280 }
 0x146 PF: > { %p16_p5 = scmp.ge.s32.totalorder %s544_s14, 6   ;;  %s699_s9 = smov %s494_s10 }
 0x147   : > { %s700_s10 = smov %s498_s11  ;;  %s701_s11 = smov %s554_s17 }
 0x148   : > { %s702_s12 = smov %s544_s14  ;;  %18 = sbr.rel (!%p16_p5) target bundleno = 6 (0x6), region = 86 }
 0x14d   :  { %250 = vsyncpa [#allocation3], 1 }
 0x14e   :  { %252 = vsyncpa [#allocation3 + $0x1], 1 }
 0x14f   :  { %253 = vsyncpa [#allocation6], 1 }
 0x150   :  { %255 = vsyncpa [#allocation6 + $0x1], 1 }
 0x151   :  { %256 = vsyncpa [#allocation4], 1 }
 0x152   :  { %258 = vsyncpa [#allocation4 + $0x1], 1 }

</bundles_post_ra>
